<compile_context>
chip_gen: v7x
topology: tpu7x:2x2x1
jax: 0.10.0
libtpu: 0.0.40
codegen_flags: <defaults>
</compile_context>

<pallas_src>
import numpy as np
import jax
import jax.numpy as jnp
from jax.experimental import pallas as pl
from jax.experimental.pallas import tpu as pltpu


def _prefix_include(scores_f32, conf, length):
    """0/1 mask of rows the sequential scan reaches before the first score < conf."""
    idx = jax.lax.broadcasted_iota(jnp.int32, (length, 1), 0)          # (L, 1)
    fail = scores_f32 < jnp.float32(conf)                              # (L, 1)
    fail_idx = jnp.where(fail, idx, jnp.int32(length))                 # (L, 1)
    first_fail = jnp.min(fail_idx, axis=0, keepdims=True)              # (1, 1)
    return (idx < first_fail).astype(jnp.float32)                      # (L, 1)


def yolov8_target_pallas(post_result, pre_post_boxes, *,
                         output_type, conf, ratio, end2end):
    """Pallas implementation of yolov8_target.forward((post_result, boxes))."""
    N, C = post_result.shape
    assert pre_post_boxes.shape == (N, 4)
    limit = min(int(N * ratio), N)   # static Python scalar

    # Dead branches: no kernel launch, no DMA.
    if limit <= 0 or output_type not in ('class', 'all', 'box'):
        return jnp.float32(0.0)

    # Only the first `limit` rows are ever scanned -> only move that prefix.
    post_prefix = post_result[:limit]                                   # (L, C)

    def scores_from(post):
        # Row-max / column-0 pick in native dtype; cast only the (L,1) scores.
        if end2end:
            s = post[:, 0:1]
        else:
            s = jnp.max(post, axis=-1, keepdims=True)
        return s.astype(jnp.float32)

    smem_out = pl.BlockSpec(memory_space=pltpu.MemorySpace.SMEM)
    vmem_in = pl.BlockSpec(memory_space=pltpu.MemorySpace.VMEM)

    if output_type in ('class', 'all'):
        # torch 'all' hits the same elif branch as 'class' (scores only),
        # and boxes are never read -> don't DMA them at all.
        def kernel(post_ref, out_ref):
            scores = scores_from(post_ref[...])                         # (L, 1) f32
            include = _prefix_include(scores, conf, limit)              # (L, 1) f32
            out_ref[0, 0] = jnp.sum(scores * include)

        out = pl.pallas_call(
            kernel,
            out_shape=jax.ShapeDtypeStruct((1, 1), jnp.float32),
            in_specs=[vmem_in],
            out_specs=smem_out,
        )(post_prefix)
    else:  # 'box'
        box_prefix = pre_post_boxes[:limit]                             # (L, 4)

        def kernel(post_ref, box_ref, out_ref):
            scores = scores_from(post_ref[...])                         # (L, 1) f32
            include = _prefix_include(scores, conf, limit)              # (L, 1) f32
            boxes = box_ref[...].astype(jnp.float32)                    # (L, 4) f32
            out_ref[0, 0] = jnp.sum(boxes * include)

        out = pl.pallas_call(
            kernel,
            out_shape=jax.ShapeDtypeStruct((1, 1), jnp.float32),
            in_specs=[vmem_in, vmem_in],
            out_specs=smem_out,
        )(post_prefix, box_prefix)

    return out[0, 0]


def ref_forward(post, boxes, output_type, conf, ratio, end2end):
    """Direct NumPy transcription of the torch forward (loop + break)."""
    post = np.asarray(post, np.float32)
    boxes = np.asarray(boxes, np.float32)
    result = []
    for i in range(int(post.shape[0] * ratio)):
        score = float(post[i, 0]) if end2end else float(post[i].max())
        if score < conf:
            break
        if output_type == 'class' or output_type == 'all':
            result.append(score)
        elif output_type == 'box' or output_type == 'all':
            for j in range(4):
                result.append(float(boxes[i, j]))
    return float(sum(result))


if __name__ == "__main__":
    key = jax.random.PRNGKey(0)
    k1, k2 = jax.random.split(key)
    N, C = 16, 8
    post_result = jax.random.uniform(k1, (N, C), dtype=jnp.float32)          # (N_boxes, num_classes)
    pre_post_boxes = jax.random.uniform(k2, (N, 4), dtype=jnp.float32) * 640.0

    # Primary config ('class' path: only the score prefix is DMA'd).
    out_cls = yolov8_target_pallas(
        post_result, pre_post_boxes,
        output_type='class', conf=0.6, ratio=0.5, end2end=False)
    out_cls = jax.block_until_ready(out_cls)
    exp_cls = ref_forward(post_result, pre_post_boxes, 'class', 0.6, 0.5, False)
    assert np.allclose(float(out_cls), exp_cls, rtol=1e-5, atol=1e-3), (float(out_cls), exp_cls)

    # Exercise the 'box' path with a higher conf so the break fires early.
    out_box = yolov8_target_pallas(
        post_result, pre_post_boxes,
        output_type='box', conf=0.9, ratio=0.5, end2end=False)
    out_box = jax.block_until_ready(out_box)
    exp_box = ref_forward(post_result, pre_post_boxes, 'box', 0.9, 0.5, False)
    assert np.allclose(float(out_box), exp_box, rtol=1e-5, atol=1e-3), (float(out_box), exp_box)

    print("KERNEL_OK")
</pallas_src>

<mosaic_0001>
module attributes {stable_mosaic.version = 11 : i64} {
  func.func @kernel(%arg0: memref<8x8xf32, #tpu.memory_space<vmem>>, %arg1: memref<1x1xf32, #tpu.memory_space<smem>>) attributes {dimension_semantics = [], scalar_prefetch = 0 : i64, scratch_operands = 0 : i64, tpu.core_type = #tpu.core_type<tc>} {
    %c0 = arith.constant 0 : index
    %c0_0 = arith.constant 0 : index
    %0 = vector.load %arg0[%c0, %c0_0] : memref<8x8xf32, #tpu.memory_space<vmem>>, vector<8x8xf32>
    %cst = arith.constant dense<0xFF800000> : vector<8xf32>
    %1 = vector.multi_reduction <maximumf>, %0, %cst [1] : vector<8x8xf32> to vector<8xf32>
    %2 = vector.shape_cast %1 : vector<8xf32> to vector<8x1xf32>
    %3 = tpu.iota {dimensions = array<i32: 0>} : vector<8x1xi32>
    %cst_1 = arith.constant 6.000000e-01 : f32
    %4 = vector.broadcast %cst_1 : f32 to vector<8x1xf32>
    %5 = arith.cmpf olt, %2, %4 : vector<8x1xf32>
    %c8_i32 = arith.constant 8 : i32
    %6 = vector.broadcast %c8_i32 : i32 to vector<8x1xi32>
    %7 = arith.select %5, %3, %6 : vector<8x1xi1>, vector<8x1xi32>
    %cst_2 = arith.constant dense<2147483647> : vector<1xi32>
    %8 = vector.multi_reduction <minsi>, %7, %cst_2 [0] : vector<8x1xi32> to vector<1xi32>
    %9 = vector.shape_cast %8 : vector<1xi32> to vector<1x1xi32>
    %10 = vector.broadcast %9 : vector<1x1xi32> to vector<8x1xi32>
    %11 = arith.cmpi slt, %3, %10 : vector<8x1xi32>
    %12 = arith.extui %11 : vector<8x1xi1> to vector<8x1xi32>
    %13 = arith.sitofp %12 : vector<8x1xi32> to vector<8x1xf32>
    %14 = arith.mulf %2, %13 : vector<8x1xf32>
    %15 = vector.shape_cast %14 : vector<8x1xf32> to vector<1x8x1xf32>
    %cst_3 = arith.constant dense<0.000000e+00> : vector<1xf32>
    %16 = vector.multi_reduction <add>, %15, %cst_3 [1, 2] : vector<1x8x1xf32> to vector<1xf32>
    %17 = vector.shape_cast %16 : vector<1xf32> to vector<1x1x1xf32>
    %18 = vector.extract %17[0, 0, 0] : f32 from vector<1x1x1xf32>
    %c0_4 = arith.constant 0 : index
    %c0_5 = arith.constant 0 : index
    %19 = memref.load %arg1[%c0_4, %c0_5] : memref<1x1xf32, #tpu.memory_space<smem>>
    memref.store %18, %arg1[%c0_4, %c0_5] : memref<1x1xf32, #tpu.memory_space<smem>>
    return
  }
}

</mosaic_0001>

<bundles_post_ra>
// kernel: tpu_custom_call.1
= control target key start
LH: loop header
LB: loop body
LE: loop exit
PB: predicated region body
PF: predicated region fallthrough
CT: control target
= control target key end

     0   :  { %6 = vsyncpa [#allocation3], 0  ;;  %s149_s0 = inlined_call_operand.hbm [shape: f32[8,8], index: 0, kind: input, shape index: {}]   ;;  %s150_s1 = inlined_call_operand.hbm [shape: f32[1,1], index: 1, kind: output, shape index: {}]  }
   0x1   :  { %7 = vsyncpa [#allocation4], 0  ;;  %s112_s6 = smov [#allocation2]   ;;  %s76_s10 = scalar_lea.hbm %s149_s0, 128 }
   0x2   :  { %s14_s7 = sshll.u32 %s112_s6, 4  ;;  %p77_p0 = scmp.ne.s32.totalorder %s149_s0, %s76_s10  ;;  %s15_s7 = int_to_ptr.vmem [resolvable:$true] %s14_s7 }
   0x3   :  { %p80_p1 = scmp.lt.u32.totalorder %s76_s10, %s149_s0 }
   0x5   :  { %p82_p2 = pnand %p80_p1, %p77_p0 }
   0x7   :  { %85 = shalt.err (!%p82_p2)
}
   0x8   :  { %s86_s15 = scalar_lea.vmem %s15_s7, 128  ;;  %p91_p4 = scmp.lt.s32.totalorder %s15_s7, %s15_s7 }
   0x9   :  { %p87_p3 = scmp.ne.s32.totalorder %s15_s7, %s86_s15  ;;  %p92_p5 = scmp.lt.s32.totalorder %s86_s15, %s86_s15 }
   0xb   :  { %p93_p6 = por %p92_p5, %p91_p4 }
   0xd   :  { %p94_p7 = pnand %p93_p6, %p87_p3 }
   0xf   :  { %97 = shalt.err (!%p94_p7)
}
  0x10   :  { %17 = dma.hbm_to_vmem [thread:$0]  %s149_s0, 128, %s15_s7, [#allocation3]  }
  0x11   :  { %108 = dma.done.wait [#allocation3], 128  }
  0x12   :  { %109 = vsyncadd [#allocation3], 4294967168  ;;  %vm22_vm0 = vcmask 64512   ;;  %v21_v0 = vld [vmem:[#allocation2] sm:$0xff]  ;;  %v26_v2 = vlaneseq  ;;  %v113_v12 = vmov 0.0   ;;  %vm43_vm6 = vcmask 7168  }
  0x13   :  { %v23_v1 = vsel %vm22_vm0, %v21_v0, -inf  ;;  %s98_s20 = scalar_lea.hbm %s150_s1, 16 }
  0x14   :  { %24 = vmax.xlane.f32.xlu0 %v23_v1  ;;  %v27_v3 = vshrl.u32 %v26_v2, 7  ;;  %p99_p8 = scmp.ne.s32.totalorder %s150_s1, %s98_s20  ;;  %p102_p9 = scmp.lt.u32.totalorder %s98_s20, %s150_s1 }
  0x16   :  { %p104_p10 = pnand %p102_p9, %p99_p8 }
  0xa1   :  { %v25_v4 = vpop.xlane.xlu0 %24 }
  0xa2   :  { %vm28_vm1 = vcmp.lt.f32.partialorder %v25_v4, 0.6 }
  0xa3   :  { %v29_v5 = vsel %vm28_vm1, %v27_v3, 8 }
  0xa4   :  { %v30_v6 = vrot.slane %v29_v5, 4 }
  0xa6   :  { %vm31_vm2 = vcmp.lt.s32.totalorder %v29_v5, %v30_v6 }
  0xa7   :  { %v32_v7 = vsel %vm31_vm2, %v29_v5, %v30_v6 }
  0xa8   :  { %v33_v8 = vrot.slane %v32_v7, 2 }
  0xaa   :  { %vm34_vm3 = vcmp.lt.s32.totalorder %v32_v7, %v33_v8 }
  0xab   :  { %v35_v9 = vsel %vm34_vm3, %v32_v7, %v33_v8 }
  0xac   :  { %v36_v10 = vrot.slane %v35_v9, 1 }
  0xae   :  { %vm37_vm4 = vcmp.lt.s32.totalorder %v35_v9, %v36_v10 }
  0xaf   :  { %v38_v11 = vsel %vm37_vm4, %v35_v9, %v36_v10 }
  0xb0   :  { %vm39_vm5 = vcmp.lt.s32.totalorder %v27_v3, %v38_v11 }
  0xb1   :  { %v70_v13 = vsel %vm39_vm5, 1.0, %v113_v12 }
  0xb2   :  { %v42_v14 = vmul.f32 %v70_v13, %v25_v4 }
  0xb4   :  { %v44_v15 = vsel %vm43_vm6, %v42_v14, 0.0 }
  0xb5   :  { %45 = vadd.xlane.f32.xlu0 %v44_v15 }
 0x142   :  { %v46_v16 = vpop.xlane.xlu0 %45 }
 0x143   :  { %v47_v17 = vrot.slane %v46_v16, 4 }
 0x145   :  { %v48_v18 = vadd.f32 %v47_v17, %v46_v16 }
 0x147   :  { %v49_v19 = vrot.slane %v48_v18, 2 }
 0x149   :  { %v50_v20 = vadd.f32 %v49_v19, %v48_v18 }
 0x14b   :  { %v51_v21 = vrot.slane %v50_v20, 1 }
 0x14d   :  { %v52_v22 = vadd.f32 %v51_v21, %v50_v20 }
 0x14f   :  { %71 = vpush %v52_v22 }
 0x180   :  { %s72_s0 = spop %71 }
 0x181   :  { %55 = sst [smem:[#allocation5]] %s72_s0 }
 0x182   :  { %107 = shalt.err (!%p104_p10)
}
 0x183   :  { %s114_s25 = smov [#allocation5]  }
 0x184   :  { %63 = dma.smem_to_hbm %s114_s25, 16, %s150_s1, [#allocation4]  }
 0x185   :  { %110 = dma.done.wait [#allocation4], 16  }
 0x186   :  { %111 = vsyncadd [#allocation4], 4294967280 }
 0x187   :  { %67 = sfence }
 0x188   :  { %68 = vsyncpa [#allocation3], 1 }
 0x189   :  { %69 = vsyncpa [#allocation4], 1 }

</bundles_post_ra>
